<compile_context>
chip_gen: v7x
topology: tpu7x:2x2x1
jax: 0.10.0
libtpu: 0.0.40
codegen_flags: <defaults>
</compile_context>

<pallas_src>
import jax
import jax.numpy as jnp
from jax.experimental import pallas as pl
from jax.experimental.pallas import tpu as pltpu


def _lip_residual_kernel(sig_ref, x_ref, y_ref, o_ref):
    # sig_ref: (1,) float32 in SMEM holding sigmoid(alpha) (precomputed once).
    a = sig_ref[0]
    xv = x_ref[...].astype(jnp.float32)
    yv = y_ref[...].astype(jnp.float32)
    o_ref[...] = (a * xv + (1.0 - a) * yv).astype(o_ref.dtype)


def _sublane(dtype):
    # Sublane packing granularity: 8 rows for 32-bit, 16 rows for 16-bit types.
    return 16 if jnp.dtype(dtype).itemsize == 2 else 8


_LANE_CANDIDATES = (4096, 2048, 1024, 512, 384, 256, 128)


def _choose_layout(total, dtype):
    """Pick a lane-dense (rows, cols) factorization; cols is a multiple of 128.

    Returns (rows, cols, pad) where `pad` flat elements of zero-padding are
    appended before reshaping (and stripped again after the kernel).
    """
    sub = _sublane(dtype)
    for cols in _LANE_CANDIDATES:
        if total % cols == 0 and (total // cols) % sub == 0:
            return total // cols, cols, 0
    # Fallback: pad the flat array up to a (sublane * 128)-aligned length.
    cols = 128
    chunk = sub * cols
    padded = ((total + chunk - 1) // chunk) * chunk
    return padded // cols, cols, padded - total


def _choose_row_tile(rows, cols, dtype):
    sub = _sublane(dtype)
    itemsize = jnp.dtype(dtype).itemsize
    # ~2 MiB per block -> 6 double-buffered tiles ~= 12 MiB of VMEM; fits the
    # 16 MiB default scoped VMEM on v5e and leaves headroom on v6e/v7x.
    target_block_bytes = 2 * 1024 * 1024
    rt = (target_block_bytes // (cols * itemsize)) // sub * sub
    rt = max(sub, min(rt, rows))
    # Megacore (v7x has 2 TensorCores): make the 'parallel' axis have >= 2
    # grid steps whenever the row count allows it.
    if pl.cdiv(rows, rt) == 1 and rows >= 2 * sub:
        half = (rows + 1) // 2
        rt = ((half + sub - 1) // sub) * sub
    return rt


def lip_residual(x, y, alpha):
    """1-Lipschitz residual blend: sigmoid(alpha) * x + (1 - sigmoid(alpha)) * y."""
    assert x.shape == y.shape, "x and y must have the same shape"
    assert x.dtype == y.dtype, "x and y must have the same dtype"
    orig_shape = x.shape
    dtype = x.dtype
    total = x.size

    # sigmoid(alpha) computed once, in float32 (never demoted to bf16/fp8).
    sig = jax.nn.sigmoid(jnp.asarray(alpha, dtype=jnp.float32)).reshape((1,))

    rows, cols, pad = _choose_layout(total, dtype)
    xf = x.reshape(-1)
    yf = y.reshape(-1)
    if pad:
        # TODO(synk): padding costs one extra HBM copy; callers with awkward
        # sizes should prefer folding this 3-op blend into a neighboring kernel.
        xf = jnp.pad(xf, (0, pad))
        yf = jnp.pad(yf, (0, pad))
    x2 = xf.reshape(rows, cols)
    y2 = yf.reshape(rows, cols)

    row_tile = _choose_row_tile(rows, cols, dtype)
    grid = (pl.cdiv(rows, row_tile),)

    out2 = pl.pallas_call(
        _lip_residual_kernel,
        out_shape=jax.ShapeDtypeStruct((rows, cols), dtype),
        grid_spec=pltpu.PrefetchScalarGridSpec(
            num_scalar_prefetch=0,
            grid=grid,
            in_specs=[
                pl.BlockSpec(memory_space=pltpu.SMEM),               # sigmoid(alpha)
                pl.BlockSpec((row_tile, cols), lambda i: (i, 0)),    # x tile
                pl.BlockSpec((row_tile, cols), lambda i: (i, 0)),    # y tile
            ],
            out_specs=pl.BlockSpec((row_tile, cols), lambda i: (i, 0)),
        ),
        compiler_params=pltpu.CompilerParams(
            dimension_semantics=("parallel",),
        ),
    )(sig, x2, y2)

    out_flat = out2.reshape(-1)
    if pad:
        out_flat = out_flat[:total]
    return out_flat.reshape(orig_shape)


def _ref_blend(x, y, alpha):
    a = jax.nn.sigmoid(jnp.float32(alpha))
    out = a * x.astype(jnp.float32) + (1.0 - a) * y.astype(jnp.float32)
    return out.astype(x.dtype)


if __name__ == "__main__":
    key = jax.random.PRNGKey(0)

    cases = [
        # (shape,             dtype,        alpha, atol)
        ((2, 4, 16, 16),  jnp.float32,  0.0,  1e-6),   # demo shape (param init = 0.0)
        ((2, 4, 14, 14),  jnp.float32,  0.3,  1e-6),   # non-lane-friendly -> padded path
        ((4, 32, 56, 56), jnp.float32, -0.7,  1e-6),   # multi-step grid / megacore split
        ((2, 4, 16, 16),  jnp.bfloat16, 0.5,  2e-2),   # bf16 traffic end-to-end
    ]

    for shape, dtype, alpha_val, atol in cases:
        key, kx, ky = jax.random.split(key, 3)
        x = jax.random.normal(kx, shape, dtype=jnp.float32).astype(dtype)
        y = jax.random.normal(ky, shape, dtype=jnp.float32).astype(dtype)
        alpha = jnp.float32(alpha_val)

        out = jax.block_until_ready(lip_residual(x, y, alpha))
        ref = _ref_blend(x, y, alpha)

        assert out.shape == x.shape and out.dtype == x.dtype
        assert jnp.allclose(out.astype(jnp.float32), ref.astype(jnp.float32),
                            atol=atol, rtol=1e-5), (shape, str(dtype))

    print("KERNEL_OK")
</pallas_src>

<mosaic_0001>
module attributes {stable_mosaic.version = 11 : i64} {
  func.func @_lip_residual_kernel(%arg0: i32, %arg1: memref<1xf32, #tpu.memory_space<smem>>, %arg2: memref<8x256xf32, #tpu.memory_space<vmem>>, %arg3: memref<8x256xf32, #tpu.memory_space<vmem>>, %arg4: memref<8x256xf32, #tpu.memory_space<vmem>>) attributes {dimension_semantics = [#tpu.dimension_semantics<parallel>], iteration_bounds = array<i64: 1>, scalar_prefetch = 0 : i64, scratch_operands = 0 : i64, tpu.core_type = #tpu.core_type<tc>, window_params = [{transform_indices = @transform_0, window_bounds = array<i64: 1>}, {transform_indices = @transform_1, window_bounds = array<i64: 8, 256>}, {transform_indices = @transform_2, window_bounds = array<i64: 8, 256>}, {transform_indices = @transform_3, window_bounds = array<i64: 8, 256>}]} {
    %c0 = arith.constant 0 : index
    %0 = memref.load %arg1[%c0] : memref<1xf32, #tpu.memory_space<smem>>
    %c0_0 = arith.constant 0 : index
    %c0_1 = arith.constant 0 : index
    %1 = vector.load %arg2[%c0_0, %c0_1] : memref<8x256xf32, #tpu.memory_space<vmem>>, vector<8x256xf32>
    %c0_2 = arith.constant 0 : index
    %c0_3 = arith.constant 0 : index
    %2 = vector.load %arg3[%c0_2, %c0_3] : memref<8x256xf32, #tpu.memory_space<vmem>>, vector<8x256xf32>
    %3 = vector.broadcast %0 : f32 to vector<8x256xf32>
    %4 = arith.mulf %3, %1 : vector<8x256xf32>
    %cst = arith.constant 1.000000e+00 : f32
    %5 = arith.subf %cst, %0 : f32
    %6 = vector.broadcast %5 : f32 to vector<8x256xf32>
    %7 = arith.mulf %6, %2 : vector<8x256xf32>
    %8 = arith.addf %4, %7 : vector<8x256xf32>
    %c0_4 = arith.constant 0 : index
    %c0_5 = arith.constant 0 : index
    %9 = vector.load %arg4[%c0_4, %c0_5] : memref<8x256xf32, #tpu.memory_space<vmem>>, vector<8x256xf32>
    tpu.vector_store %arg4[%c0_4, %c0_5], %8 {strides = array<i32>} : memref<8x256xf32, #tpu.memory_space<vmem>>, vector<8x256xf32>,
    return
  }
  func.func @transform_0(%arg0: i32) -> i32 {
    %c0_i32 = arith.constant 0 : i32
    %c0_i32_0 = arith.constant 0 : i32
    return %c0_i32 : i32
  }
  func.func @transform_1(%arg0: i32) -> (i32, i32) {
    %c0_i32 = arith.constant 0 : i32
    %c0_i32_0 = arith.constant 0 : i32
    return %arg0, %c0_i32 : i32, i32
  }
  func.func @transform_2(%arg0: i32) -> (i32, i32) {
    %c0_i32 = arith.constant 0 : i32
    %c0_i32_0 = arith.constant 0 : i32
    return %arg0, %c0_i32 : i32, i32
  }
  func.func @transform_3(%arg0: i32) -> (i32, i32) {
    %c0_i32 = arith.constant 0 : i32
    %c0_i32_0 = arith.constant 0 : i32
    return %arg0, %c0_i32 : i32, i32
  }
}

</mosaic_0001>

<bundles_post_ra>
// kernel: tpu_custom_call.1
= control target key start
LH: loop header
LB: loop body
LE: loop exit
PB: predicated region body
PF: predicated region fallthrough
CT: control target
= control target key end

     0   :  { %9 = vsyncpa [#allocation4], 0  ;;  %s212_s0 = inlined_call_operand.<no memory space> [shape: f32[1], index: 0, kind: input, shape index: {}]   ;;  %s213_s1 = inlined_call_operand.hbm [shape: f32[8,256], index: 1, kind: input, shape index: {}]   ;;  %s214_s2 = inlined_call_operand.hbm [shape: f32[8,256], index: 2, kind: input, shape index: {}]   ;;  %s215_s3 = inlined_call_operand.hbm [shape: f32[8,256], index: 3, kind: output, shape index: {}]  }
   0x1   :  { %10 = vsyncpa [#allocation7], 0 }
   0x2   :  { %11 = vsyncpa [#allocation5], 0  ;;  %s147_s12 = smov [#allocation3]   ;;  %s148_s14 = smov [#allocation6]  }
   0x3   :  { %s20_s13 = sshll.u32 %s147_s12, 4  ;;  %s30_s15 = sshll.u32 %s148_s14, 4  ;;  %s21_s13 = int_to_ptr.vmem [resolvable:$true] %s20_s13  ;;  %s31_s15 = int_to_ptr.vmem [resolvable:$true] %s30_s15 }
   0x4   :  { %s75_s18 = scalar_lea.hbm %s213_s1, 256 }
   0x5   :  { %p76_p0 = scmp.ne.s32.totalorder %s213_s1, %s75_s18  ;;  %p79_p1 = scmp.lt.u32.totalorder %s75_s18, %s213_s1 }
   0x7   :  { %p81_p2 = pnand %p79_p1, %p76_p0 }
   0x9   :  { %84 = shalt.err (!%p81_p2)
}
   0xa   :  { %s85_s23 = scalar_lea.vmem %s21_s13, 256  ;;  %p90_p4 = scmp.lt.s32.totalorder %s21_s13, %s21_s13 }
   0xb   :  { %p86_p3 = scmp.ne.s32.totalorder %s21_s13, %s85_s23  ;;  %p91_p5 = scmp.lt.s32.totalorder %s85_s23, %s85_s23 }
   0xd   :  { %p92_p6 = por %p91_p5, %p90_p4 }
   0xf   :  { %p93_p7 = pnand %p92_p6, %p86_p3 }
  0x11   :  { %96 = shalt.err (!%p93_p7)
}
  0x12   :  { %23 = dma.hbm_to_vmem [thread:$0]  %s213_s1, 256, %s21_s13, [#allocation4]  }
  0x13   :  { %s97_s28 = scalar_lea.hbm %s214_s2, 256 }
  0x14   :  { %p98_p8 = scmp.ne.s32.totalorder %s214_s2, %s97_s28  ;;  %p101_p9 = scmp.lt.u32.totalorder %s97_s28, %s214_s2 }
  0x16   :  { %p103_p10 = pnand %p101_p9, %p98_p8 }
  0x18   :  { %106 = shalt.err (!%p103_p10)
}
  0x19   :  { %s107_s6 = scalar_lea.vmem %s31_s15, 256  ;;  %p112_p12 = scmp.lt.s32.totalorder %s31_s15, %s31_s15 }
  0x1a   :  { %p108_p11 = scmp.ne.s32.totalorder %s31_s15, %s107_s6  ;;  %p113_p13 = scmp.lt.s32.totalorder %s107_s6, %s107_s6 }
  0x1c   :  { %p114_p0 = por %p113_p13, %p112_p12 }
  0x1e   :  { %p115_p1 = pnand %p114_p0, %p108_p11 }
  0x20   :  { %118 = shalt.err (!%p115_p1)
}
  0x21   :  { %33 = dma.hbm_to_vmem [thread:$0]  %s214_s2, 256, %s31_s15, [#allocation7]  }
  0x22   :  { %141 = dma.done.wait [#allocation4], 256  }
  0x23   :  { %142 = vsyncadd [#allocation4], 4294967040 }
  0x24   :  { %143 = dma.done.wait [#allocation7], 256  }
  0x25   :  { %144 = vsyncadd [#allocation7], 4294967040  ;;  %s48_s10 = ssub.f32 1.0, %s212_s0  ;;  %v45_v0 = vstv %s212_s0  ;;  %v41_v2 = vld [vmem:[#allocation3] sm:$0xff]  ;;  %v43_v3 = vld [vmem:[#allocation6] sm:$0xff]  ;;  %s149_s2 = smov [#allocation8]  }
  0x26   :  { %v42_v4 = vld [vmem:[#allocation3 + $0x8] sm:$0xff]  ;;  %v46_v5 = vmul.f32 %v45_v0, %v41_v2  ;;  %v44_v7 = vld [vmem:[#allocation6 + $0x8] sm:$0xff]  ;;  %s62_s13 = sshll.u32 %s149_s2, 4  ;;  %s63_s13 = int_to_ptr.vmem [resolvable:$true] %s62_s13 }
  0x27   :  { %v49_v1 = vstv %s48_s10  ;;  %v47_v8 = vmul.f32 %v45_v0, %v42_v4  ;;  %s119_s14 = scalar_lea.vmem %s63_s13, 256  ;;  %p124_p3 = scmp.lt.s32.totalorder %s63_s13, %s63_s13 }
  0x28   :  { %v50_v6 = vmul.f32 %v49_v1, %v43_v3  ;;  %v51_v9 = vmul.f32 %v49_v1, %v44_v7  ;;  %p120_p2 = scmp.ne.s32.totalorder %s63_s13, %s119_s14  ;;  %p125_p4 = scmp.lt.s32.totalorder %s119_s14, %s119_s14 }
  0x2a   :  { %v52_v10 = vadd.f32 %v50_v6, %v46_v5  ;;  %v53_v11 = vadd.f32 %v51_v9, %v47_v8  ;;  %p126_p5 = por %p125_p4, %p124_p3 }
  0x2c   :  { %54 = vst [vmem:[#allocation8] sm:$0xff] %v52_v10  ;;  %55 = vst [vmem:[#allocation8 + $0x8] sm:$0xff] %v53_v11  ;;  %p127_p6 = pnand %p126_p5, %p120_p2 }
  0x2e   :  { %130 = shalt.err (!%p127_p6)
}
  0x2f   :  { %s131_s16 = scalar_lea.hbm %s215_s3, 256 }
  0x30   :  { %p132_p7 = scmp.ne.s32.totalorder %s215_s3, %s131_s16  ;;  %p135_p8 = scmp.lt.u32.totalorder %s131_s16, %s215_s3 }
  0x32   :  { %p137_p9 = pnand %p135_p8, %p132_p7 }
  0x34   :  { %140 = shalt.err (!%p137_p9)
}
  0x35   :  { %65 = dma.vmem_to_hbm [thread:$0]  %s63_s13, 256, %s215_s3, [#allocation5]  }
  0x36   :  { %145 = dma.done.wait [#allocation5], 256  }
  0x37   :  { %146 = vsyncadd [#allocation5], 4294967040 }
  0x38   :  { %69 = vsyncpa [#allocation4], 1 }
  0x39   :  { %70 = vsyncpa [#allocation7], 1 }
  0x3a   :  { %71 = vsyncpa [#allocation5], 1 }

</bundles_post_ra>
